<compile_context>
chip_gen: v7x
topology: tpu7x:2x2x1
jax: 0.10.0
libtpu: 0.0.40
codegen_flags: <defaults>
</compile_context>

<pallas_src>
import functools

import jax
import jax.numpy as jnp
import numpy as np
from jax.experimental import pallas as pl
from jax.experimental.pallas import tpu as pltpu

_LANE = 128
_SUBLANE = 8
_DEFAULT_MAX_BLOCK_ROWS = 2048   # (2048, 128) f32 block = 1 MiB / stream / pipeline buffer


def _logpt_elem(x, t):
    # Per-element -BCE = t*log(x) + (1-t)*log(1-x) with PyTorch's -100 clamp on
    # the log terms, factored as log(1-x) + t*(log(x) - log(1-x)) (fewer VPU ops).
    log_x = jnp.maximum(jnp.log(x), -100.0)
    log_1mx = jnp.maximum(jnp.log(1.0 - x), -100.0)
    return log_1mx + t * (log_x - log_1mx)


def _focal_sum_kernel(*refs, tm, has_weights):
    if has_weights:
        meta_ref, x_ref, t_ref, w_ref, o_ref = refs
    else:
        meta_ref, x_ref, t_ref, o_ref = refs
        w_ref = None

    s = pl.program_id(1)
    gb = pl.program_id(0) * pl.num_programs(1) + s   # global row-block index
    rows = meta_ref[0]          # number of valid 128-wide rows (runtime scalar)
    last_block = meta_ref[1]    # index of last block containing valid rows

    @pl.when(s == 0)
    def _init():
        o_ref[...] = jnp.zeros_like(o_ref)

    x = x_ref[...].astype(jnp.float32)
    t = t_ref[...].astype(jnp.float32)
    w = w_ref[...].astype(jnp.float32) if has_weights else None

    @pl.when(gb < last_block)
    def _body():
        per = _logpt_elem(x, t)
        if has_weights:
            per = per * w
        # Fold (tm, 128) -> (8, 128) with whole-vreg VPU adds into the resident output.
        o_ref[...] += per.reshape(-1, _SUBLANE, _LANE).sum(axis=0)[None]

    @pl.when(gb == last_block)
    def _last():
        # The last real block may be ragged in rows; the edge block's OOB rows are
        # undefined, so sanitize before the logs and zero after.
        row_ids = jax.lax.broadcasted_iota(jnp.int32, (tm, _LANE), 0)
        mask = gb * tm + row_ids < rows
        xs = jnp.where(mask, x, 0.5)
        ts = jnp.where(mask, t, 0.5)
        per = _logpt_elem(xs, ts)
        if has_weights:
            per = per * w
        per = jnp.where(mask, per, 0.0)
        o_ref[...] += per.reshape(-1, _SUBLANE, _LANE).sum(axis=0)[None]

    # Blocks with gb > last_block (redundant tail of the rectangular 2-core grid)
    # contribute nothing; their index_map is clamped so the DMA stays in bounds.


def focal_loss(inputs, targets, weights=None, focusing_param=2.0, balance_param=0.25,
               *, max_block_rows=None):
    """Matches FocalLoss.forward: returns a scalar float32."""
    x = inputs.reshape(-1)
    t = targets.reshape(-1)
    n = int(x.shape[0])

    has_weights = weights is not None
    if has_weights:
        w = weights
        if tuple(w.shape) != tuple(inputs.shape):
            # TODO(synk): keep small (per-channel / per-row) weights un-broadcast and
            # index them in-kernel instead of materializing a full-size HBM copy.
            w = jnp.broadcast_to(w, inputs.shape)
        w = w.reshape(-1)

    if max_block_rows is None:
        max_block_rows = _DEFAULT_MAX_BLOCK_ROWS
    max_block_rows = max(_SUBLANE, (max_block_rows // _SUBLANE) * _SUBLANE)

    n_main = (n // _LANE) * _LANE          # 128-aligned prefix handled by the kernel
    rows = n_main // _LANE
    tail = n - n_main

    g = float(focusing_param)
    gamma = int(g) if g.is_integer() else g   # integer_pow matches torch for int gamma

    total = jnp.float32(0.0)

    if rows > 0:
        tm = min(max_block_rows, ((rows + _SUBLANE - 1) // _SUBLANE) * _SUBLANE)
        blocks_total = -(-rows // tm)
        num_cores = 2 if blocks_total >= 2 else 1   # leading "parallel" axis (v7x megacore)
        steps = -(-blocks_total // num_cores)

        operands = [x[:n_main].reshape(rows, _LANE), t[:n_main].reshape(rows, _LANE)]
        if has_weights:
            operands.append(w[:n_main].reshape(rows, _LANE))

        # Runtime metadata via scalar prefetch: one compiled kernel per (tm, grid)
        # geometry, independent of the exact element count.
        meta = jnp.array([rows, blocks_total - 1], dtype=jnp.int32)

        def in_map(c, s, meta_ref):
            # Clamp so a redundant trailing block of the rectangular 2-core grid
            # never DMAs out of bounds (its compute is skipped in-kernel).
            return (jnp.minimum(c * steps + s, meta_ref[1]), 0)

        block_spec = pl.BlockSpec((tm, _LANE), in_map)

        kernel = functools.partial(_focal_sum_kernel, tm=tm, has_weights=has_weights)

        in_bytes = sum(int(np.prod(op.shape)) * op.dtype.itemsize for op in operands)
        flops_per_elem = 8 if has_weights else 7

        partials = pl.pallas_call(
            kernel,
            out_shape=jax.ShapeDtypeStruct((num_cores, _SUBLANE, _LANE), jnp.float32),
            grid_spec=pltpu.PrefetchScalarGridSpec(
                num_scalar_prefetch=1,
                grid=(num_cores, steps),
                in_specs=[block_spec] * len(operands),
                out_specs=pl.BlockSpec((1, _SUBLANE, _LANE),
                                       lambda c, s, meta_ref: (c, 0, 0)),
            ),
            compiler_params=pltpu.CompilerParams(
                dimension_semantics=("parallel", "arbitrary"),
                vmem_limit_bytes=32 * 1024 * 1024,
            ),
            cost_estimate=pl.CostEstimate(
                flops=flops_per_elem * n_main,
                transcendentals=2 * n_main,
                bytes_accessed=in_bytes + num_cores * _SUBLANE * _LANE * 4,
            ),
        )(meta, *operands)
        total = total + jnp.sum(partials)

    if tail > 0:
        # <=127 leftover elements: tiny jnp reduction (no HBM-copying concatenate pad).
        xt = x[n_main:].astype(jnp.float32)
        tt = t[n_main:].astype(jnp.float32)
        per = _logpt_elem(xt, tt)
        if has_weights:
            per = per * w[n_main:].astype(jnp.float32)
        total = total + jnp.sum(per)

    logpt = total / jnp.float32(n)        # mean of (-BCE) == logpt
    pt = jnp.exp(logpt)
    focal = -((1.0 - pt) ** gamma) * logpt
    return jnp.float32(balance_param) * focal


def _focal_ref(inputs, targets, weights=None, gamma=2, alpha=0.25):
    x = inputs.reshape(-1).astype(jnp.float32)
    t = targets.reshape(-1).astype(jnp.float32)
    log_x = jnp.maximum(jnp.log(x), -100.0)
    log_1mx = jnp.maximum(jnp.log(1.0 - x), -100.0)
    per = -(t * log_x + (1.0 - t) * log_1mx)
    if weights is not None:
        per = per * jnp.broadcast_to(weights, inputs.shape).reshape(-1).astype(jnp.float32)
    bce = jnp.mean(per)
    logpt = -bce
    pt = jnp.exp(logpt)
    return alpha * (-((1.0 - pt) ** gamma) * logpt)


if __name__ == "__main__":
    key = jax.random.PRNGKey(0)
    k1, k2, k3, k4, k5, k6 = jax.random.split(key, 6)

    # NCHW-style inputs: batch=2, channels=4, spatial=16x16; probabilities in (0, 1).
    shape = (2, 4, 16, 16)
    inputs = jax.nn.sigmoid(jax.random.normal(k1, shape, dtype=jnp.float32))
    targets = jax.random.bernoulli(k2, 0.5, shape).astype(jnp.float32)
    weights = jax.random.uniform(k3, shape, dtype=jnp.float32)

    loss_u = focal_loss(inputs, targets)
    loss_w = focal_loss(inputs, targets, weights)
    jax.block_until_ready((loss_u, loss_w))

    assert np.allclose(np.asarray(loss_u), np.asarray(_focal_ref(inputs, targets)),
                       rtol=1e-5, atol=1e-6), (loss_u, _focal_ref(inputs, targets))
    assert np.allclose(np.asarray(loss_w), np.asarray(_focal_ref(inputs, targets, weights)),
                       rtol=1e-5, atol=1e-6), (loss_w, _focal_ref(inputs, targets, weights))

    # Ragged case: exercises the 2-core grid, the clamped redundant block, the
    # partial-last-block row mask and the <128-element tail path (a small
    # max_block_rows forces multiple blocks at a tiny size).
    shape2 = (41, 61)   # 2501 elements -> 19 full 128-wide rows + 69-element tail
    inputs2 = jax.nn.sigmoid(jax.random.normal(k4, shape2, dtype=jnp.float32))
    targets2 = jax.random.bernoulli(k5, 0.5, shape2).astype(jnp.float32)
    weights2 = jax.random.uniform(k6, shape2, dtype=jnp.float32)

    loss2_u = focal_loss(inputs2, targets2, max_block_rows=8)
    loss2_w = focal_loss(inputs2, targets2, weights2, max_block_rows=8)
    jax.block_until_ready((loss2_u, loss2_w))

    assert np.allclose(np.asarray(loss2_u), np.asarray(_focal_ref(inputs2, targets2)),
                       rtol=1e-5, atol=1e-6), (loss2_u, _focal_ref(inputs2, targets2))
    assert np.allclose(np.asarray(loss2_w), np.asarray(_focal_ref(inputs2, targets2, weights2)),
                       rtol=1e-5, atol=1e-6), (loss2_w, _focal_ref(inputs2, targets2, weights2))

    print("KERNEL_OK")
</pallas_src>

<mosaic_0001>
module attributes {stable_mosaic.version = 11 : i64} {
  func.func @_focal_sum_kernel(%arg0: i32, %arg1: i32, %arg2: memref<2xi32, #tpu.memory_space<smem>>, %arg3: memref<16x128xf32, #tpu.memory_space<vmem>>, %arg4: memref<16x128xf32, #tpu.memory_space<vmem>>, %arg5: memref<1x8x128xf32, #tpu.memory_space<vmem>>) attributes {dimension_semantics = [#tpu.dimension_semantics<parallel>, #tpu.dimension_semantics<arbitrary>], iteration_bounds = array<i64: 1, 1>, scalar_prefetch = 1 : i64, scratch_operands = 0 : i64, tpu.core_type = #tpu.core_type<tc>, window_params = [{transform_indices = @transform_0, window_bounds = array<i64: 16, 128>}, {transform_indices = @transform_1, window_bounds = array<i64: 16, 128>}, {transform_indices = @transform_2, window_bounds = array<i64: 1, 8, 128>}]} {
    %c1_i32 = arith.constant 1 : i32
    %0 = arith.muli %arg0, %c1_i32 : i32
    %1 = arith.addi %0, %arg1 : i32
    %c0 = arith.constant 0 : index
    %2 = memref.load %arg2[%c0] : memref<2xi32, #tpu.memory_space<smem>>
    %c1 = arith.constant 1 : index
    %3 = memref.load %arg2[%c1] : memref<2xi32, #tpu.memory_space<smem>>
    %c0_i32 = arith.constant 0 : i32
    %4 = arith.cmpi eq, %arg1, %c0_i32 : i32
    %5 = arith.extui %4 : i1 to i32
    %c0_i32_0 = arith.constant 0 : i32
    %6 = arith.cmpi ne, %5, %c0_i32_0 : i32
    scf.if %6 {
      %cst = arith.constant 0.000000e+00 : f32
      %15 = vector.broadcast %cst : f32 to vector<1x8x128xf32>
      %c0_7 = arith.constant 0 : index
      %c0_8 = arith.constant 0 : index
      %c0_9 = arith.constant 0 : index
      %16 = vector.load %arg5[%c0_7, %c0_8, %c0_9] : memref<1x8x128xf32, #tpu.memory_space<vmem>>, vector<1x8x128xf32>
      tpu.vector_store %arg5[%c0_7, %c0_8, %c0_9], %15 {strides = array<i32>} : memref<1x8x128xf32, #tpu.memory_space<vmem>>, vector<1x8x128xf32>,
    } else {
    }
    %c0_1 = arith.constant 0 : index
    %c0_2 = arith.constant 0 : index
    %7 = vector.load %arg3[%c0_1, %c0_2] : memref<16x128xf32, #tpu.memory_space<vmem>>, vector<16x128xf32>
    %c0_3 = arith.constant 0 : index
    %c0_4 = arith.constant 0 : index
    %8 = vector.load %arg4[%c0_3, %c0_4] : memref<16x128xf32, #tpu.memory_space<vmem>>, vector<16x128xf32>
    %9 = arith.cmpi slt, %1, %3 : i32
    %10 = arith.extui %9 : i1 to i32
    %c0_i32_5 = arith.constant 0 : i32
    %11 = arith.cmpi ne, %10, %c0_i32_5 : i32
    scf.if %11 {
      %15 = math.log %7 : vector<16x128xf32>
      %cst = arith.constant -1.000000e+02 : f32
      %16 = vector.broadcast %cst : f32 to vector<16x128xf32>
      %17 = arith.maximumf %15, %16 : vector<16x128xf32>
      %cst_7 = arith.constant 1.000000e+00 : f32
      %18 = vector.broadcast %cst_7 : f32 to vector<16x128xf32>
      %19 = arith.subf %18, %7 : vector<16x128xf32>
      %20 = math.log %19 : vector<16x128xf32>
      %cst_8 = arith.constant -1.000000e+02 : f32
      %21 = vector.broadcast %cst_8 : f32 to vector<16x128xf32>
      %22 = arith.maximumf %20, %21 : vector<16x128xf32>
      %23 = arith.subf %17, %22 : vector<16x128xf32>
      %24 = arith.mulf %8, %23 : vector<16x128xf32>
      %25 = arith.addf %22, %24 : vector<16x128xf32>
      %c0_9 = arith.constant 0 : index
      %c0_10 = arith.constant 0 : index
      %c0_11 = arith.constant 0 : index
      %26 = vector.load %arg5[%c0_9, %c0_10, %c0_11] : memref<1x8x128xf32, #tpu.memory_space<vmem>>, vector<1x8x128xf32>
      %27 = vector.shape_cast %25 : vector<16x128xf32> to vector<2x8x128xf32>
      %cst_12 = arith.constant dense<0.000000e+00> : vector<8x128xf32>
      %28 = vector.multi_reduction <add>, %27, %cst_12 [0] : vector<2x8x128xf32> to vector<8x128xf32>
      %29 = vector.shape_cast %28 : vector<8x128xf32> to vector<1x8x128xf32>
      %30 = arith.addf %26, %29 : vector<1x8x128xf32>
      %c0_13 = arith.constant 0 : index
      %c0_14 = arith.constant 0 : index
      %c0_15 = arith.constant 0 : index
      %31 = vector.load %arg5[%c0_13, %c0_14, %c0_15] : memref<1x8x128xf32, #tpu.memory_space<vmem>>, vector<1x8x128xf32>
      tpu.vector_store %arg5[%c0_13, %c0_14, %c0_15], %30 {strides = array<i32>} : memref<1x8x128xf32, #tpu.memory_space<vmem>>, vector<1x8x128xf32>,
    } else {
    }
    %12 = arith.cmpi eq, %1, %3 : i32
    %13 = arith.extui %12 : i1 to i32
    %c0_i32_6 = arith.constant 0 : i32
    %14 = arith.cmpi ne, %13, %c0_i32_6 : i32
    scf.if %14 {
      %15 = tpu.iota {dimensions = array<i32: 0>} : vector<16x128xi32>
      %c16_i32 = arith.constant 16 : i32
      %16 = arith.muli %1, %c16_i32 : i32
      %17 = vector.broadcast %16 : i32 to vector<16x128xi32>
      %18 = arith.addi %17, %15 : vector<16x128xi32>
      %19 = vector.broadcast %2 : i32 to vector<16x128xi32>
      %20 = arith.cmpi slt, %18, %19 : vector<16x128xi32>
      %cst = arith.constant 5.000000e-01 : f32
      %21 = vector.broadcast %cst : f32 to vector<16x128xf32>
      %22 = arith.select %20, %7, %21 : vector<16x128xi1>, vector<16x128xf32>
      %cst_7 = arith.constant 5.000000e-01 : f32
      %23 = vector.broadcast %cst_7 : f32 to vector<16x128xf32>
      %24 = arith.select %20, %8, %23 : vector<16x128xi1>, vector<16x128xf32>
      %25 = math.log %22 : vector<16x128xf32>
      %cst_8 = arith.constant -1.000000e+02 : f32
      %26 = vector.broadcast %cst_8 : f32 to vector<16x128xf32>
      %27 = arith.maximumf %25, %26 : vector<16x128xf32>
      %cst_9 = arith.constant 1.000000e+00 : f32
      %28 = vector.broadcast %cst_9 : f32 to vector<16x128xf32>
      %29 = arith.subf %28, %22 : vector<16x128xf32>
      %30 = math.log %29 : vector<16x128xf32>
      %cst_10 = arith.constant -1.000000e+02 : f32
      %31 = vector.broadcast %cst_10 : f32 to vector<16x128xf32>
      %32 = arith.maximumf %30, %31 : vector<16x128xf32>
      %33 = arith.subf %27, %32 : vector<16x128xf32>
      %34 = arith.mulf %24, %33 : vector<16x128xf32>
      %35 = arith.addf %32, %34 : vector<16x128xf32>
      %cst_11 = arith.constant 0.000000e+00 : f32
      %36 = vector.broadcast %cst_11 : f32 to vector<16x128xf32>
      %37 = arith.select %20, %35, %36 : vector<16x128xi1>, vector<16x128xf32>
      %c0_12 = arith.constant 0 : index
      %c0_13 = arith.constant 0 : index
      %c0_14 = arith.constant 0 : index
      %38 = vector.load %arg5[%c0_12, %c0_13, %c0_14] : memref<1x8x128xf32, #tpu.memory_space<vmem>>, vector<1x8x128xf32>
      %39 = vector.shape_cast %37 : vector<16x128xf32> to vector<2x8x128xf32>
      %cst_15 = arith.constant dense<0.000000e+00> : vector<8x128xf32>
      %40 = vector.multi_reduction <add>, %39, %cst_15 [0] : vector<2x8x128xf32> to vector<8x128xf32>
      %41 = vector.shape_cast %40 : vector<8x128xf32> to vector<1x8x128xf32>
      %42 = arith.addf %38, %41 : vector<1x8x128xf32>
      %c0_16 = arith.constant 0 : index
      %c0_17 = arith.constant 0 : index
      %c0_18 = arith.constant 0 : index
      %43 = vector.load %arg5[%c0_16, %c0_17, %c0_18] : memref<1x8x128xf32, #tpu.memory_space<vmem>>, vector<1x8x128xf32>
      tpu.vector_store %arg5[%c0_16, %c0_17, %c0_18], %42 {strides = array<i32>} : memref<1x8x128xf32, #tpu.memory_space<vmem>>, vector<1x8x128xf32>,
    } else {
    }
    return
  }
  func.func @transform_0(%arg0: i32, %arg1: i32, %arg2: memref<2xi32, #tpu.memory_space<smem>>) -> (i32, i32) {
    %c1_i32 = arith.constant 1 : i32
    %0 = arith.muli %arg0, %c1_i32 : i32
    %1 = arith.addi %0, %arg1 : i32
    %c1 = arith.constant 1 : index
    %2 = memref.load %arg2[%c1] : memref<2xi32, #tpu.memory_space<smem>>
    %3 = arith.minsi %1, %2 : i32
    %c0_i32 = arith.constant 0 : i32
    %c0_i32_0 = arith.constant 0 : i32
    return %3, %c0_i32 : i32, i32
  }
  func.func @transform_1(%arg0: i32, %arg1: i32, %arg2: memref<2xi32, #tpu.memory_space<smem>>) -> (i32, i32) {
    %c1_i32 = arith.constant 1 : i32
    %0 = arith.muli %arg0, %c1_i32 : i32
    %1 = arith.addi %0, %arg1 : i32
    %c1 = arith.constant 1 : index
    %2 = memref.load %arg2[%c1] : memref<2xi32, #tpu.memory_space<smem>>
    %3 = arith.minsi %1, %2 : i32
    %c0_i32 = arith.constant 0 : i32
    %c0_i32_0 = arith.constant 0 : i32
    return %3, %c0_i32 : i32, i32
  }
  func.func @transform_2(%arg0: i32, %arg1: i32, %arg2: memref<2xi32, #tpu.memory_space<smem>>) -> (i32, i32, i32) {
    %c0_i32 = arith.constant 0 : i32
    %c0_i32_0 = arith.constant 0 : i32
    %c0_i32_1 = arith.constant 0 : i32
    return %arg0, %c0_i32, %c0_i32_0 : i32, i32, i32
  }
}

</mosaic_0001>

<bundles_post_ra>
// kernel: tpu_custom_call.1
= control target key start
LH: loop header
LB: loop body
LE: loop exit
PB: predicated region body
PF: predicated region fallthrough
CT: control target
= control target key end

     0   :  { %s417_s0 = inlined_call_operand.hbm [shape: s32[2], index: 0, kind: input, shape index: {}]   ;;  %s418_s1 = inlined_call_operand.hbm [shape: f32[16,128], index: 1, kind: input, shape index: {}]   ;;  %s419_s2 = inlined_call_operand.hbm [shape: f32[16,128], index: 2, kind: input, shape index: {}]   ;;  %s420_s3 = inlined_call_operand.hbm [shape: f32[1,8,128], index: 3, kind: output, shape index: {}]  }
   0x1   :  { %s211_s14 = scalar_lea.hbm %s417_s0, 16 }
   0x2   :  { %p212_p0 = scmp.ne.s32.totalorder %s417_s0, %s211_s14  ;;  %p215_p1 = scmp.lt.u32.totalorder %s211_s14, %s417_s0 }
   0x4   :  { %p217_p2 = pnand %p215_p1, %p212_p0 }
   0x6   :  { %220 = shalt.err (!%p217_p2)  }
   0x7   :  { %s299_s19 = smov [#allocation3]  }
   0x8   :  { %9 = dma.hbm_to_smem %s417_s0, 16, %s299_s19, [#allocation2] }
   0x9   :  { %291 = dma.done.wait [#allocation2], 16 }
   0xa   :  { %292 = vsyncadd [#allocation2], 4294967280 }
   0xb   :  { %11 = sfence }
   0xc   :  { %12 = vsyncpa [#allocation5], 0 }
   0xd   :  { %13 = vsyncpa [#allocation8], 0 }
   0xe   :  { %14 = vsyncpa [#allocation6], 0  ;;  %s173_s22 = sld [smem:[#allocation3 + $0x1]]  ;;  %s300_s23 = smov [#allocation4]  }
   0xf   :  { %s27_s24 = sshll.u32 %s300_s23, 4  ;;  %s301_s25 = smov [#allocation7]   ;;  %s28_s24 = int_to_ptr.vmem [resolvable:$true] %s27_s24 }
  0x10   :  { %s46_s26 = sshll.u32 %s301_s25, 4  ;;  %s223_s9 = scalar_lea.hbm %s418_s1, 256  ;;  %s338_s26 = int_to_ptr.vmem [resolvable:$true] %s46_s26 }
  0x14   :  { %p174_p3 = scmp.gt.s32.totalorder %s173_s22, 0 }
  0x16   :  { %s426_s22 = smov (%p174_p3, %s173_s22), 0 }
  0x17   :  { %s186_s27 = sshll.u32 %s426_s22, 8 }
  0x18   :  { %s26_s0 = scalar_lea.hbm %s418_s1, %s186_s27  ;;  %s346_s5 = scalar_lea.hbm %s419_s2, %s186_s27 }
  0x19   :  { %s221_s6 = scalar_lea.hbm %s26_s0, 256  ;;  %p224_p5 = scmp.lt.u32.totalorder %s26_s0, %s418_s1 }
  0x1a   :  { %p222_p4 = scmp.ne.s32.totalorder %s26_s0, %s221_s6  ;;  %p225_p6 = scmp.lt.u32.totalorder %s223_s9, %s221_s6 }
  0x1b   :  { %p227_p8 = scmp.lt.u32.totalorder %s221_s6, %s26_s0 }
  0x1c   :  { %p226_p7 = por %p225_p6, %p224_p5 }
  0x1e   :  { %p228_p9 = por %p227_p8, %p226_p7 }
  0x20   :  { %p229_p10 = pnand %p228_p9, %p222_p4 }
  0x22   :  { %232 = shalt.err (!%p229_p10)
}
  0x23   :  { %s233_s12 = scalar_lea.vmem %s28_s24, 256  ;;  %p238_p12 = scmp.lt.s32.totalorder %s28_s24, %s28_s24 }
  0x24   :  { %p234_p11 = scmp.ne.s32.totalorder %s28_s24, %s233_s12  ;;  %p239_p13 = scmp.lt.s32.totalorder %s233_s12, %s233_s12 }
  0x26   :  { %p240_p0 = por %p239_p13, %p238_p12 }
  0x28   :  { %p241_p1 = pnand %p240_p0, %p234_p11 }
  0x2a   :  { %244 = shalt.err (!%p241_p1)
}
  0x2b   :  { %s302_s13 = smov 128   ;;  %s303_s14 = smov 8  }
  0x2c   :  { %33 = dma.hbm_to_vmem [thread:$0]  %s26_s0, 256, %s28_s24, [#allocation5], %s302_s13, %s302_s13, %s303_s14  }
  0x2d   :  { %s245_s1 = scalar_lea.hbm %s346_s5, 256  ;;  %s247_s17 = scalar_lea.hbm %s419_s2, 256 }
  0x2e   :  { %p246_p2 = scmp.ne.s32.totalorder %s346_s5, %s245_s1  ;;  %p248_p3 = scmp.lt.u32.totalorder %s346_s5, %s419_s2 }
  0x2f   :  { %p249_p4 = scmp.lt.u32.totalorder %s247_s17, %s245_s1  ;;  %p251_p6 = scmp.lt.u32.totalorder %s245_s1, %s346_s5 }
  0x31   :  { %p250_p5 = por %p249_p4, %p248_p3 }
  0x33   :  { %p252_p7 = por %p251_p6, %p250_p5 }
  0x35   :  { %p253_p8 = pnand %p252_p7, %p246_p2 }
  0x37   :  { %256 = shalt.err (!%p253_p8)
}
  0x38   :  { %s257_s20 = scalar_lea.vmem %s338_s26, 256  ;;  %p262_p10 = scmp.lt.s32.totalorder %s338_s26, %s338_s26 }
  0x39   :  { %p258_p9 = scmp.ne.s32.totalorder %s338_s26, %s257_s20  ;;  %p263_p11 = scmp.lt.s32.totalorder %s257_s20, %s257_s20 }
  0x3b   :  { %p264_p12 = por %p263_p11, %p262_p10 }
  0x3d   :  { %p265_p13 = pnand %p264_p12, %p258_p9 }
  0x3f   :  { %268 = shalt.err (!%p265_p13)
}
  0x40   :  { %52 = dma.hbm_to_vmem [thread:$0]  %s346_s5, 256, %s338_s26, [#allocation8], %s302_s13, %s302_s13, %s303_s14  }
  0x41   :  { %293 = dma.done.wait [#allocation5], 256  }
  0x42   :  { %294 = vsyncadd [#allocation5], 4294967040 }
  0x43   :  { %295 = dma.done.wait [#allocation8], 256  }
  0x44   :  { %296 = vsyncadd [#allocation8], 4294967040  ;;  %s370_s2 = sld [smem:[#allocation3]]  ;;  %s372_s21 = sld [smem:[#allocation3 + $0x1]]  ;;  %v304_v0 = vmov 0.0   ;;  %v77_v1 = vld [vmem:[#allocation4] sm:$0xff] }
  0x45   :  { %76 = vst [vmem:[#allocation9] sm:$0xff] %v304_v0  ;;  %v78_v2 = vld [vmem:[#allocation4 + $0x8] sm:$0xff]  ;;  %v374_v3 = vld [vmem:[#allocation7] sm:$0xff]  ;;  %v376_v4 = vld [vmem:[#allocation7 + $0x8] sm:$0xff] }
  0x4a   :  { %p183_p0 = scmp.le.s32.totalorder %s372_s21, 0 }
  0x4b   :  { %195 = vlog2.f32 (!%p183_p0), %v77_v1  ;;  %v91_v5 = vsub.f32 (!%p183_p0), 1.0, %v77_v1  ;;  %v92_v6 = vsub.f32 (!%p183_p0), 1.0, %v78_v2 }
  0x4c   :  { %84 = sbr.rel (%p183_p0) target bundleno = 104 (0x68), region = 25  ;;  %197 = vlog2.f32 (!%p183_p0), %v78_v2  ;;  %v105_v25 = vld [vmem:[#allocation9] sm:$0xff] (!%p183_p0) }
  0x4d   :  { %199 = vlog2.f32 (!%p183_p0), %v91_v5 }
  0x4e   :  { %201 = vlog2.f32 (!%p183_p0), %v92_v6 }
  0x55   :  { %v196_v7 = vpop.eup %195 }
  0x56   :  { %v198_v8 = vpop.eup %197  ;;  %v86_v9 = vmul.f32 0.6931472, %v196_v7 }
  0x57   :  { %v200_v10 = vpop.eup %199  ;;  %v88_v11 = vmul.f32 0.6931472, %v198_v8 }
  0x58   :  { %v202_v12 = vpop.eup %201  ;;  %v89_v13 = vmax.f32 %v86_v9, -100.0  ;;  %v94_v14 = vmul.f32 0.6931472, %v200_v10 }
  0x59   :  { %v90_v15 = vmax.f32 %v88_v11, -100.0  ;;  %v96_v16 = vmul.f32 0.6931472, %v202_v12 }
  0x5a   :  { %v97_v17 = vmax.f32 %v94_v14, -100.0 }
  0x5b   :  { %v98_v18 = vmax.f32 %v96_v16, -100.0 }
  0x5c   :  { %v99_v19 = vsub.f32 %v89_v13, %v97_v17 }
  0x5d   :  { %v100_v20 = vsub.f32 %v90_v15, %v98_v18 }
  0x5e   :  { %v101_v21 = vmul.f32 %v99_v19, %v374_v3 }
  0x5f   :  { %v102_v22 = vmul.f32 %v100_v20, %v376_v4 }
  0x60   :  { %v103_v23 = vadd.f32 %v101_v21, %v97_v17 }
  0x61   :  { %v104_v24 = vadd.f32 %v102_v22, %v98_v18 }
  0x63   :  { %v106_v26 = vadd.f32 %v104_v24, %v103_v23 }
  0x65   :  { %v107_v27 = vadd.f32 %v106_v26, %v105_v25 }
  0x67   :  { %108 = vst [vmem:[#allocation9] sm:$0xff] %v107_v27 }
  0x68 PF:  { %p185_p1 = scmp.ne.s32.totalorder %s372_s21, 0 }
  0x69   :  { %v113_v28 = vlaneseq (!%p185_p1)  ;;  %v120_v29 = vstv (!%p185_p1), %s370_s2 }
  0x6a   :  { %112 = sbr.rel (%p185_p1) target bundleno = 142 (0x8e), region = 29 }
  0x6b   :  { %v114_v30 = vshrl.u32 (!%p185_p1), %v113_v28, 7 }
  0x6d   :  { %v115_v31 = vadd.s32 (!%p185_p1), 8, %v114_v30  ;;  %vm383_vm0 = vcmp.lt.s32.totalorder (!%p185_p1), %v114_v30, %v120_v29 }
  0x6e   :  { %v123_v33 = vsel (!%p185_p1), %vm383_vm0, %v77_v1, 0.5  ;;  %v125_v49 = vsel (!%p185_p1), %vm383_vm0, %v374_v3, 0.5  ;;  %v149_v60 = vld [vmem:[#allocation9] sm:$0xff] (!%p185_p1) }
  0x6f   :  { %vm389_vm1 = vcmp.lt.s32.totalorder (!%p185_p1), %v115_v31, %v120_v29  ;;  %203 = vlog2.f32 (!%p185_p1), %v123_v33  ;;  %v133_v35 = vsub.f32 (!%p185_p1), 1.0, %v123_v33 }
  0x70   :  { %v124_v36 = vsel (!%p185_p1), %vm389_vm1, %v78_v2, 0.5  ;;  %v126_v51 = vsel (!%p185_p1), %vm389_vm1, %v376_v4, 0.5 }
  0x71   :  { %205 = vlog2.f32 %v124_v36  ;;  %v134_v37 = vsub.f32 1.0, %v124_v36 }
  0x72   :  { %207 = vlog2.f32 %v133_v35 }
  0x73   :  { %209 = vlog2.f32 %v134_v37 }
  0x79   :  { %v204_v38 = vpop.eup %203 }
  0x7a   :  { %v128_v39 = vmul.f32 0.6931472, %v204_v38 }
  0x7b   :  { %v206_v40 = vpop.eup %205 }
  0x7c   :  { %v208_v41 = vpop.eup %207  ;;  %v130_v42 = vmul.f32 0.6931472, %v206_v40  ;;  %v131_v44 = vmax.f32 %v128_v39, -100.0 }
  0x7d   :  { %v210_v43 = vpop.eup %209  ;;  %v136_v45 = vmul.f32 0.6931472, %v208_v41 }
  0x7e   :  { %v132_v46 = vmax.f32 %v130_v42, -100.0  ;;  %v138_v47 = vmul.f32 0.6931472, %v210_v43 }
  0x7f   :  { %v139_v48 = vmax.f32 %v136_v45, -100.0 }
  0x80   :  { %v140_v50 = vmax.f32 %v138_v47, -100.0 }
  0x81   :  { %v141_v52 = vsub.f32 %v131_v44, %v139_v48 }
  0x82   :  { %v142_v53 = vsub.f32 %v132_v46, %v140_v50 }
  0x83   :  { %v143_v54 = vmul.f32 %v141_v52, %v125_v49 }
  0x84   :  { %v144_v55 = vmul.f32 %v142_v53, %v126_v51 }
  0x85   :  { %v145_v56 = vadd.f32 %v143_v54, %v139_v48 }
  0x86   :  { %v146_v57 = vadd.f32 %v144_v55, %v140_v50 }
  0x87   :  { %v147_v58 = vsel %vm383_vm0, %v145_v56, 0.0 }
  0x88   :  { %v148_v59 = vsel %vm389_vm1, %v146_v57, 0.0 }
  0x89   :  { %v150_v61 = vadd.f32 %v148_v59, %v147_v58 }
  0x8b   :  { %v151_v62 = vadd.f32 %v150_v61, %v149_v60 }
  0x8d   :  { %152 = vst [vmem:[#allocation9] sm:$0xff] %v151_v62 }
  0x8e PF:  { %s305_s22 = smov [#allocation9]  }
  0x8f   :  { %s159_s23 = sshll.u32 %s305_s22, 4  ;;  %s160_s23 = int_to_ptr.vmem [resolvable:$true] %s159_s23 }
  0x90   :  { %s269_s24 = scalar_lea.vmem %s160_s23, 128  ;;  %p274_p3 = scmp.lt.s32.totalorder %s160_s23, %s160_s23 }
  0x91   :  { %p270_p2 = scmp.ne.s32.totalorder %s160_s23, %s269_s24  ;;  %p275_p4 = scmp.lt.s32.totalorder %s269_s24, %s269_s24 }
  0x93   :  { %p276_p5 = por %p275_p4, %p274_p3 }
  0x95   :  { %p277_p6 = pnand %p276_p5, %p270_p2 }
  0x97   :  { %280 = shalt.err (!%p277_p6)
}
  0x98   :  { %s281_s27 = scalar_lea.hbm %s420_s3, 128 }
  0x99   :  { %p282_p7 = scmp.ne.s32.totalorder %s420_s3, %s281_s27  ;;  %p285_p8 = scmp.lt.u32.totalorder %s281_s27, %s420_s3 }
  0x9b   :  { %p287_p9 = pnand %p285_p8, %p282_p7 }
  0x9d   :  { %290 = shalt.err (!%p287_p9)
}
  0x9e   :  { %162 = dma.vmem_to_hbm [thread:$0]  %s160_s23, 128, %s420_s3, [#allocation6]  }
  0x9f   :  { %297 = dma.done.wait [#allocation6], 128  }
  0xa0   :  { %298 = vsyncadd [#allocation6], 4294967168 }
  0xa1   :  { %166 = vsyncpa [#allocation5], 1 }
  0xa2   :  { %167 = vsyncpa [#allocation8], 1 }
  0xa3   :  { %168 = vsyncpa [#allocation6], 1 }

</bundles_post_ra>
